<compile_context>
chip_gen: v6e
topology: v6e:2x2x1
jax: 0.10.0
libtpu: 0.0.40
codegen_flags: <defaults>
</compile_context>

<pallas_src>
import jax
import jax.numpy as jnp
from jax.experimental import pallas as pl
from jax.experimental.pallas import tpu as pltpu


def _round_up(x, m):
    return ((x + m - 1) // m) * m


def _cdiv(a, b):
    return -(-a // b)


def _choose_tf(F, cap):
    """Largest multiple-of-128 divisor of F not exceeding cap (else F).

    F must be tiled exactly (no partial F blocks) because the F axis is a
    reduction -- garbage columns would be accumulated into the output."""
    if F <= cap:
        return F
    tf = (cap // 128) * 128
    while tf >= 128:
        if F % tf == 0:
            return tf
        tf -= 128
    return F


def _spec(shape, index_map, nbuf=None):
    """BlockSpec with optional explicit buffer count (graceful fallback)."""
    if nbuf is None:
        return pl.BlockSpec(shape, index_map)
    try:
        return pl.BlockSpec(shape, index_map, pipeline_mode=pl.Buffered(nbuf))
    except TypeError:  # older jax without pipeline_mode kwarg
        return pl.BlockSpec(shape, index_map)


def ffn_layer_kernel(x_ref, w1_ref, b1_ref, w2_ref, b2_ref, g_ref, beta_ref,
                     o_ref, acc_ref):
    fk = pl.program_id(1)

    @pl.when(fk == 0)
    def _():
        acc_ref[...] = jnp.zeros_like(acc_ref)

    x = x_ref[...]                                           # (TM, D) bf16

    # linear1 (F block) + bias + ReLU: bf16 MXU inputs, f32 accumulation.
    h = jnp.dot(x, w1_ref[...], preferred_element_type=jnp.float32) + b1_ref[...]
    h = jnp.maximum(h, 0.0).astype(jnp.bfloat16)

    # linear2 (F block): accumulate the partial y into the f32 scratch.
    acc_ref[...] += jnp.dot(h, w2_ref[...], preferred_element_type=jnp.float32)

    @pl.when(fk == pl.num_programs(1) - 1)
    def _():
        # + b2, residual, LayerNorm (post-norm, eps=1e-5) -- all f32.
        res = x.astype(jnp.float32) + acc_ref[...] + b2_ref[...]
        mean = jnp.mean(res, axis=-1, keepdims=True)
        cen = res - mean
        var = jnp.mean(cen * cen, axis=-1, keepdims=True)
        normed = cen * jax.lax.rsqrt(var + 1e-5)             # rsqrt -> EUP slot
        o_ref[...] = (normed * g_ref[...] + beta_ref[...]).astype(o_ref.dtype)


def ffn_layer(tgt, params, *, block_rows=256, block_f=512):
    """FFNLayer.forward_post.  tgt: (..., D) float32.  Returns same shape."""
    w1, b1, w2, b2, gamma, beta = params       # w1:(D,F) w2:(F,D) pre-transposed
    D = tgt.shape[-1]
    F = w1.shape[1]
    orig_shape = tgt.shape
    out_dtype = tgt.dtype

    # Flatten all leading dims into one row axis; bf16 activations for the MXU.
    x = tgt.reshape(-1, D).astype(jnp.bfloat16)
    M = x.shape[0]

    # Row tile: multiple of 16 (bf16 sublane packing); aim for >= 2 grid steps
    # on the parallel axis when M allows it (v7x megacore has 2 TCs).
    TM = min(max(block_rows, 16), _round_up(max(_cdiv(M, 2), 1), 16))
    num_m = _cdiv(M, TM)                        # partial last block is masked

    # Stream dim_feedforward in TF-sized blocks (reduction axis, innermost).
    TF = _choose_tf(F, block_f)
    num_f = F // TF

    # bf16 weights; biases / gamma / beta pre-shaped to (1, N) in f32.
    w1_b = w1.astype(jnp.bfloat16)
    w2_b = w2.astype(jnp.bfloat16)
    b1_2 = b1.reshape(1, F).astype(jnp.float32)
    b2_2 = b2.reshape(1, D).astype(jnp.float32)
    g_2 = gamma.reshape(1, D).astype(jnp.float32)
    be_2 = beta.reshape(1, D).astype(jnp.float32)

    # Constant-index operands only need a single VMEM buffer.
    w_nbuf = 1 if num_f == 1 else 2

    in_specs = [
        _spec((TM, D), lambda i, f: (i, 0)),              # x row tile
        _spec((D, TF), lambda i, f: (0, f), w_nbuf),      # W1 column block
        _spec((1, TF), lambda i, f: (0, f), w_nbuf),      # b1 block
        _spec((TF, D), lambda i, f: (f, 0), w_nbuf),      # W2 row block
        _spec((1, D), lambda i, f: (0, 0), 1),            # b2
        _spec((1, D), lambda i, f: (0, 0), 1),            # gamma
        _spec((1, D), lambda i, f: (0, 0), 1),            # beta
    ]

    # Explicit VMEM budget (2x margin), capped safely below physical VMEM.
    need = (2 * TM * D * 2                       # x bf16, double buffered
            + 2 * TM * D * 4                     # out f32, double buffered
            + w_nbuf * (D * TF * 2 + TF * 4 + TF * D * 2)
            + 3 * D * 4                          # b2 / gamma / beta
            + TM * D * 4                         # acc scratch
            + TM * TF * 6)                       # h (f32 + bf16 temporaries)
    try:
        cap = int(getattr(pltpu.get_tpu_info(), "vmem_capacity_bytes", 64 << 20))
    except Exception:
        cap = 64 << 20                           # conservative (v7x per-TC)
    vmem_limit = int(min(max(2 * need + (4 << 20), 32 << 20), int(cap * 0.9)))

    cost = pl.CostEstimate(
        flops=4 * M * D * F,                     # two M x D x F matmuls
        transcendentals=M,                       # one rsqrt per row
        bytes_accessed=(M * D * 2 + M * D * 4 + 2 * D * F * 2
                        + (F + 3 * D) * 4),
    )

    out = pl.pallas_call(
        ffn_layer_kernel,
        out_shape=jax.ShapeDtypeStruct((M, D), out_dtype),
        grid=(num_m, num_f),
        in_specs=in_specs,
        out_specs=pl.BlockSpec((TM, D), lambda i, f: (i, 0)),
        scratch_shapes=[pltpu.VMEM((TM, D), jnp.float32)],
        compiler_params=pltpu.CompilerParams(
            dimension_semantics=("parallel", "arbitrary"),
            vmem_limit_bytes=vmem_limit),
        cost_estimate=cost,
    )(x, w1_b, b1_2, w2_b, b2_2, g_2, be_2)

    return out.reshape(orig_shape)


def init_params(key, d_model, dim_feedforward):
    """Mirrors the PyTorch module init: xavier_uniform_ on 2-D weights
    (_reset_parameters), nn.Linear default uniform biases, ones/zeros LN."""
    k1, k2, k3, k4 = jax.random.split(key, 4)
    bound1 = (6.0 / (d_model + dim_feedforward)) ** 0.5
    w1 = jax.random.uniform(k1, (dim_feedforward, d_model), jnp.float32,
                            -bound1, bound1)                 # torch layout (F, D)
    bound2 = (6.0 / (dim_feedforward + d_model)) ** 0.5
    w2 = jax.random.uniform(k2, (d_model, dim_feedforward), jnp.float32,
                            -bound2, bound2)                 # torch layout (D, F)
    bb1 = 1.0 / (d_model ** 0.5)
    b1 = jax.random.uniform(k3, (dim_feedforward,), jnp.float32, -bb1, bb1)
    bb2 = 1.0 / (dim_feedforward ** 0.5)
    b2 = jax.random.uniform(k4, (d_model,), jnp.float32, -bb2, bb2)
    gamma = jnp.ones((d_model,), jnp.float32)
    beta = jnp.zeros((d_model,), jnp.float32)
    # Pre-transpose so the kernel computes  x @ W  directly.
    return (w1.T, b1, w2.T, b2, gamma, beta)


def reference_jax(tgt, params):
    """Pure-JAX f32 reference of forward_post."""
    w1, b1, w2, b2, gamma, beta = params
    h = jnp.maximum(tgt @ w1 + b1, 0.0)
    y = h @ w2 + b2
    res = tgt + y
    mean = jnp.mean(res, axis=-1, keepdims=True)
    var = jnp.mean((res - mean) ** 2, axis=-1, keepdims=True)
    return (res - mean) * jax.lax.rsqrt(var + 1e-5) * gamma + beta


if __name__ == "__main__":
    # NOTE: D=32 / F=128 is deliberately tiny for the harness; production
    # shapes should use D a multiple of 128 for lane-dense stores.
    B, S, D, F = 2, 8, 32, 128   # batch, seq, d_model, dim_feedforward

    key = jax.random.PRNGKey(0)
    kx, kw, kx2 = jax.random.split(key, 3)
    tgt = jax.random.normal(kx, (B, S, D), jnp.float32)
    params = init_params(kw, D, F)

    out = jax.block_until_ready(ffn_layer(tgt, params))
    ref = reference_jax(tgt, params)
    assert out.shape == (B, S, D)
    # bf16 MXU inputs -> loosened tolerance vs the f32 reference.
    assert jnp.allclose(out, ref, atol=3e-2, rtol=3e-2), "mismatch vs JAX reference"

    # Ragged row count (M % TM != 0) exercises Pallas' masked partial blocks.
    tgt2 = jax.random.normal(kx2, (3, 5, D), jnp.float32)
    out2 = jax.block_until_ready(ffn_layer(tgt2, params))
    ref2 = reference_jax(tgt2, params)
    assert jnp.allclose(out2, ref2, atol=3e-2, rtol=3e-2), "ragged mismatch"

    # TODO(synk): dropout (p=0.0) is a no-op and is not implemented as a
    # stochastic op; only forward_post (normalize_before=False) is implemented.
    print("KERNEL_OK")
</pallas_src>

<mosaic_0001>
module attributes {stable_mosaic.version = 11 : i64} {
  func.func @ffn_layer_kernel(%arg0: i32, %arg1: i32, %arg2: memref<16x32xbf16, #tpu.memory_space<vmem>>, %arg3: memref<32x128xbf16, #tpu.memory_space<vmem>>, %arg4: memref<1x128xf32, #tpu.memory_space<vmem>>, %arg5: memref<128x32xbf16, #tpu.memory_space<vmem>>, %arg6: memref<1x32xf32, #tpu.memory_space<vmem>>, %arg7: memref<1x32xf32, #tpu.memory_space<vmem>>, %arg8: memref<1x32xf32, #tpu.memory_space<vmem>>, %arg9: memref<16x32xf32, #tpu.memory_space<vmem>>, %arg10: memref<16x32xf32, #tpu.memory_space<vmem>>) attributes {dimension_semantics = [#tpu.dimension_semantics<parallel>, #tpu.dimension_semantics<arbitrary>], iteration_bounds = array<i64: 1, 1>, scalar_prefetch = 0 : i64, scratch_operands = 1 : i64, tpu.core_type = #tpu.core_type<tc>, window_params = [{transform_indices = @transform_0, window_bounds = array<i64: 16, 32>}, {pipeline_mode = #tpu.pipeline_mode<synchronous>, transform_indices = @transform_1, window_bounds = array<i64: 32, 128>}, {pipeline_mode = #tpu.pipeline_mode<synchronous>, transform_indices = @transform_2, window_bounds = array<i64: 1, 128>}, {pipeline_mode = #tpu.pipeline_mode<synchronous>, transform_indices = @transform_3, window_bounds = array<i64: 128, 32>}, {pipeline_mode = #tpu.pipeline_mode<synchronous>, transform_indices = @transform_4, window_bounds = array<i64: 1, 32>}, {pipeline_mode = #tpu.pipeline_mode<synchronous>, transform_indices = @transform_5, window_bounds = array<i64: 1, 32>}, {pipeline_mode = #tpu.pipeline_mode<synchronous>, transform_indices = @transform_6, window_bounds = array<i64: 1, 32>}, {transform_indices = @transform_7, window_bounds = array<i64: 16, 32>}]} {
    %c0_i32 = arith.constant 0 : i32
    %0 = arith.cmpi eq, %arg1, %c0_i32 : i32
    %1 = arith.extui %0 : i1 to i32
    %c0_i32_0 = arith.constant 0 : i32
    %2 = arith.cmpi ne, %1, %c0_i32_0 : i32
    scf.if %2 {
      %cst_16 = arith.constant 0.000000e+00 : f32
      %20 = vector.broadcast %cst_16 : f32 to vector<16x32xf32>
      %c0_17 = arith.constant 0 : index
      %c0_18 = arith.constant 0 : index
      %21 = vector.load %arg10[%c0_17, %c0_18] : memref<16x32xf32, #tpu.memory_space<vmem>>, vector<16x32xf32>
      tpu.vector_store %arg10[%c0_17, %c0_18], %20 {strides = array<i32>} : memref<16x32xf32, #tpu.memory_space<vmem>>, vector<16x32xf32>,
    } else {
    }
    %c0 = arith.constant 0 : index
    %c0_1 = arith.constant 0 : index
    %3 = vector.load %arg2[%c0, %c0_1] : memref<16x32xbf16, #tpu.memory_space<vmem>>, vector<16x32xbf16>
    %c0_2 = arith.constant 0 : index
    %c0_3 = arith.constant 0 : index
    %4 = vector.load %arg3[%c0_2, %c0_3] : memref<32x128xbf16, #tpu.memory_space<vmem>>, vector<32x128xbf16>
    %cst = arith.constant dense<0.000000e+00> : vector<16x128xf32>
    %5 = tpu.matmul %3, %4, %cst {dimension_numbers = #tpu.dot_dimension_numbers<[1], [0], [0], [1], [0, 0, 1, 1], [], []>} : vector<16x32xbf16>, vector<32x128xbf16>, vector<16x128xf32> -> vector<16x128xf32>
    %c0_4 = arith.constant 0 : index
    %c0_5 = arith.constant 0 : index
    %6 = vector.load %arg4[%c0_4, %c0_5] : memref<1x128xf32, #tpu.memory_space<vmem>>, vector<1x128xf32>
    %7 = vector.broadcast %6 : vector<1x128xf32> to vector<16x128xf32>
    %8 = arith.addf %5, %7 : vector<16x128xf32>
    %cst_6 = arith.constant 0.000000e+00 : f32
    %9 = vector.broadcast %cst_6 : f32 to vector<16x128xf32>
    %10 = arith.maximumf %8, %9 : vector<16x128xf32>
    %11 = arith.truncf %10 : vector<16x128xf32> to vector<16x128xbf16>
    %c0_7 = arith.constant 0 : index
    %c0_8 = arith.constant 0 : index
    %12 = vector.load %arg10[%c0_7, %c0_8] : memref<16x32xf32, #tpu.memory_space<vmem>>, vector<16x32xf32>
    %c0_9 = arith.constant 0 : index
    %c0_10 = arith.constant 0 : index
    %13 = vector.load %arg5[%c0_9, %c0_10] : memref<128x32xbf16, #tpu.memory_space<vmem>>, vector<128x32xbf16>
    %cst_11 = arith.constant dense<0.000000e+00> : vector<16x32xf32>
    %14 = tpu.matmul %11, %13, %cst_11 {dimension_numbers = #tpu.dot_dimension_numbers<[1], [0], [0], [1], [0, 0, 1, 1], [], []>} : vector<16x128xbf16>, vector<128x32xbf16>, vector<16x32xf32> -> vector<16x32xf32>
    %15 = arith.addf %12, %14 : vector<16x32xf32>
    %c0_12 = arith.constant 0 : index
    %c0_13 = arith.constant 0 : index
    %16 = vector.load %arg10[%c0_12, %c0_13] : memref<16x32xf32, #tpu.memory_space<vmem>>, vector<16x32xf32>
    tpu.vector_store %arg10[%c0_12, %c0_13], %15 {strides = array<i32>} : memref<16x32xf32, #tpu.memory_space<vmem>>, vector<16x32xf32>,
    %c0_i32_14 = arith.constant 0 : i32
    %17 = arith.cmpi eq, %arg1, %c0_i32_14 : i32
    %18 = arith.extui %17 : i1 to i32
    %c0_i32_15 = arith.constant 0 : i32
    %19 = arith.cmpi ne, %18, %c0_i32_15 : i32
    scf.if %19 {
      %20 = arith.extf %3 : vector<16x32xbf16> to vector<16x32xf32>
      %c0_16 = arith.constant 0 : index
      %c0_17 = arith.constant 0 : index
      %21 = vector.load %arg10[%c0_16, %c0_17] : memref<16x32xf32, #tpu.memory_space<vmem>>, vector<16x32xf32>
      %22 = arith.addf %20, %21 : vector<16x32xf32>
      %c0_18 = arith.constant 0 : index
      %c0_19 = arith.constant 0 : index
      %23 = vector.load %arg6[%c0_18, %c0_19] : memref<1x32xf32, #tpu.memory_space<vmem>>, vector<1x32xf32>
      %24 = vector.broadcast %23 : vector<1x32xf32> to vector<16x32xf32>
      %25 = arith.addf %22, %24 : vector<16x32xf32>
      %cst_20 = arith.constant dense<0.000000e+00> : vector<16xf32>
      %26 = vector.multi_reduction <add>, %25, %cst_20 [1] : vector<16x32xf32> to vector<16xf32>
      %27 = vector.shape_cast %26 : vector<16xf32> to vector<16x1xf32>
      %cst_21 = arith.constant 3.200000e+01 : f32
      %28 = vector.broadcast %cst_21 : f32 to vector<16x1xf32>
      %29 = arith.divf %27, %28 : vector<16x1xf32>
      %30 = vector.broadcast %29 : vector<16x1xf32> to vector<16x32xf32>
      %31 = arith.subf %25, %30 : vector<16x32xf32>
      %32 = arith.mulf %31, %31 : vector<16x32xf32>
      %cst_22 = arith.constant dense<0.000000e+00> : vector<16xf32>
      %33 = vector.multi_reduction <add>, %32, %cst_22 [1] : vector<16x32xf32> to vector<16xf32>
      %34 = vector.shape_cast %33 : vector<16xf32> to vector<16x1xf32>
      %cst_23 = arith.constant 3.200000e+01 : f32
      %35 = vector.broadcast %cst_23 : f32 to vector<16x1xf32>
      %36 = arith.divf %34, %35 : vector<16x1xf32>
      %cst_24 = arith.constant 9.99999974E-6 : f32
      %37 = vector.broadcast %cst_24 : f32 to vector<16x1xf32>
      %38 = arith.addf %36, %37 : vector<16x1xf32>
      %39 = math.rsqrt %38 : vector<16x1xf32>
      %40 = vector.broadcast %39 : vector<16x1xf32> to vector<16x32xf32>
      %41 = arith.mulf %31, %40 : vector<16x32xf32>
      %c0_25 = arith.constant 0 : index
      %c0_26 = arith.constant 0 : index
      %42 = vector.load %arg7[%c0_25, %c0_26] : memref<1x32xf32, #tpu.memory_space<vmem>>, vector<1x32xf32>
      %43 = vector.broadcast %42 : vector<1x32xf32> to vector<16x32xf32>
      %44 = arith.mulf %41, %43 : vector<16x32xf32>
      %c0_27 = arith.constant 0 : index
      %c0_28 = arith.constant 0 : index
      %45 = vector.load %arg8[%c0_27, %c0_28] : memref<1x32xf32, #tpu.memory_space<vmem>>, vector<1x32xf32>
      %46 = vector.broadcast %45 : vector<1x32xf32> to vector<16x32xf32>
      %47 = arith.addf %44, %46 : vector<16x32xf32>
      %c0_29 = arith.constant 0 : index
      %c0_30 = arith.constant 0 : index
      %48 = vector.load %arg9[%c0_29, %c0_30] : memref<16x32xf32, #tpu.memory_space<vmem>>, vector<16x32xf32>
      tpu.vector_store %arg9[%c0_29, %c0_30], %47 {strides = array<i32>} : memref<16x32xf32, #tpu.memory_space<vmem>>, vector<16x32xf32>,
    } else {
    }
    return
  }
  func.func @transform_0(%arg0: i32, %arg1: i32) -> (i32, i32) {
    %c0_i32 = arith.constant 0 : i32
    %c0_i32_0 = arith.constant 0 : i32
    return %arg0, %c0_i32 : i32, i32
  }
  func.func @transform_1(%arg0: i32, %arg1: i32) -> (i32, i32) {
    %c0_i32 = arith.constant 0 : i32
    %c0_i32_0 = arith.constant 0 : i32
    return %c0_i32, %arg1 : i32, i32
  }
  func.func @transform_2(%arg0: i32, %arg1: i32) -> (i32, i32) {
    %c0_i32 = arith.constant 0 : i32
    %c0_i32_0 = arith.constant 0 : i32
    return %c0_i32, %arg1 : i32, i32
  }
  func.func @transform_3(%arg0: i32, %arg1: i32) -> (i32, i32) {
    %c0_i32 = arith.constant 0 : i32
    %c0_i32_0 = arith.constant 0 : i32
    return %arg1, %c0_i32 : i32, i32
  }
  func.func @transform_4(%arg0: i32, %arg1: i32) -> (i32, i32) {
    %c0_i32 = arith.constant 0 : i32
    %c0_i32_0 = arith.constant 0 : i32
    %c0_i32_1 = arith.constant 0 : i32
    return %c0_i32, %c0_i32_0 : i32, i32
  }
  func.func @transform_5(%arg0: i32, %arg1: i32) -> (i32, i32) {
    %c0_i32 = arith.constant 0 : i32
    %c0_i32_0 = arith.constant 0 : i32
    %c0_i32_1 = arith.constant 0 : i32
    return %c0_i32, %c0_i32_0 : i32, i32
  }
  func.func @transform_6(%arg0: i32, %arg1: i32) -> (i32, i32) {
    %c0_i32 = arith.constant 0 : i32
    %c0_i32_0 = arith.constant 0 : i32
    %c0_i32_1 = arith.constant 0 : i32
    return %c0_i32, %c0_i32_0 : i32, i32
  }
  func.func @transform_7(%arg0: i32, %arg1: i32) -> (i32, i32) {
    %c0_i32 = arith.constant 0 : i32
    %c0_i32_0 = arith.constant 0 : i32
    return %arg0, %c0_i32 : i32, i32
  }
}

</mosaic_0001>

<bundles_post_ra>
// kernel: tpu_custom_call.1
= control target key start
LH: loop header
LB: loop body
LE: loop exit
PB: predicated region body
PF: predicated region fallthrough
CT: control target
= control target key end

     0   :  { %v404_v1 = vmov 0.0   ;;  %vm405_vm0 = vmmov 0   ;;  %vm32_vm1 = vcmask 261120   ;;  %s508_s0 = inlined_call_operand.vmem [shape: bf16[16,32], index: 0, kind: input, shape index: {}]   ;;  %s509_s1 = inlined_call_operand.vmem [shape: bf16[32,128], index: 1, kind: input, shape index: {}]   ;;  %s510_s2 = inlined_call_operand.vmem [shape: f32[1,128], index: 2, kind: input, shape index: {}]   ;;  %s511_s3 = inlined_call_operand.vmem [shape: bf16[128,32], index: 3, kind: input, shape index: {}]   ;;  %s512_s4 = inlined_call_operand.vmem [shape: f32[1,32], index: 4, kind: input, shape index: {}]   ;;  %s513_s5 = inlined_call_operand.vmem [shape: f32[1,32], index: 5, kind: input, shape index: {}]   ;;  %s514_s6 = inlined_call_operand.vmem [shape: f32[1,32], index: 6, kind: input, shape index: {}]   ;;  %s515_s7 = inlined_call_operand.hbm [shape: f32[16,32], index: 7, kind: output, shape index: {}]  }
   0x1   :  { %v366_v0 = vld [vmem:[%s509_s1 + $0x8] sm:$0xff]   ;;  %333 = vmatprep.subr.bf16.mxu0 %v404_v1  ;;  %v367_v2 = vld [vmem:[%s509_s1] sm:$0xff]   ;;  %341 = vmatprep.subr.bf16.mxu1 %v404_v1  ;;  %33 = vst.msk [vmem:[#allocation2] sm:$0xff] %vm32_vm1, %v404_v1  ;;  %34 = vst.msk [vmem:[#allocation2 + $0x8] sm:$0xff] %vm32_vm1, %v404_v1 }
   0x2   :  { %334 = vmatpush3.bf16.msra.mxu0 %v366_v0  ;;  %337 = vmatprep.mubr.msk.bf16.mxu0 %vm405_vm0, %v404_v1  ;;  %v35_v3 = vld [vmem:[%s508_s0] sm:$0xff]   ;;  %v369_v4 = vld [vmem:[%s511_s3 + $0x38] sm:$0xff]   ;;  %v370_v5 = vld [vmem:[%s511_s3 + $0x30] sm:$0xff]  }
   0x3   :  { %335 = vmatprep.subr.bf16.mxu0 %v404_v1  ;;  %357 = vmatprep.mubr.msk.bf16.mxu1 %vm405_vm0, %v404_v1  ;;  %v371_v6 = vld [vmem:[%s511_s3 + $0x28] sm:$0xff]  }
   0x4   :  { %342 = vmatpush3.bf16.msra.mxu1 %v369_v4 }
   0x5   :  { %343 = vmatprep.subr.bf16.mxu1 %v404_v1 }
   0x6   :  { %336 = vmatpush3.bf16.msra.mxu0 %v367_v2 }
   0x8   :  { %344 = vmatpush3.bf16.msra.mxu1 %v370_v5 }
   0x9   :  { %338 = vmatmul.mubr.msk.bf16.vlgmr.msra.gmra.mxu0 %vm32_vm1, %v35_v3 }
   0xa   :  { %12 = vsyncpa [#allocation4], 0  ;;  %345 = vmatprep.subr.bf16.mxu1 %v404_v1  ;;  %v372_v7 = vld [vmem:[%s511_s3 + $0x20] sm:$0xff]   ;;  %v373_v8 = vld [vmem:[%s511_s3 + $0x18] sm:$0xff]   ;;  %v227_v30 = vunpack.c.l.bf16 %v35_v3  ;;  %v228_v34 = vunpack.c.h.bf16 %v35_v3  ;;  %s406_s26 = smov [#allocation3]  }
   0xb   :  { %v374_v9 = vld [vmem:[%s511_s3 + $0x10] sm:$0xff]   ;;  %v375_v10 = vld [vmem:[%s511_s3 + $0x8] sm:$0xff]   ;;  %v376_v11 = vld [vmem:[%s511_s3] sm:$0xff]   ;;  %s294_s27 = sshll.u32 %s406_s26, 4  ;;  %s295_s27 = int_to_ptr.vmem [resolvable:$true] %s294_s27 }
   0xc   :  { %346 = vmatpush3.bf16.msra.mxu1 %v371_v6  ;;  %v305_v12 = vld [vmem:[%s510_s2] ss:$0 sm:$0xff]  ;;  %v114_v26 = vld [vmem:[#allocation2 + $0x8] sm:$0xff]  ;;  %s382_s28 = scalar_lea.vmem %s295_s27, 256  ;;  %p387_p1 = scmp.lt.s32.totalorder %s295_s27, %s295_s27 }
   0xd   :  { %347 = vmatprep.subr.bf16.mxu1 %v404_v1  ;;  %v113_v22 = vld [vmem:[#allocation2] sm:$0xff]  ;;  %p383_p0 = scmp.ne.s32.totalorder %s295_s27, %s382_s28  ;;  %p388_p2 = scmp.lt.s32.totalorder %s382_s28, %s382_s28 }
   0xe   :  { %v318_v32 = vld [vmem:[%s512_s4] ss:$0 sm:$0xff] }
   0xf   :  { %v319_v58 = vld [vmem:[%s513_s5] ss:$0 sm:$0xff]  ;;  %p389_p3 = por %p388_p2, %p387_p1 }
  0x10   :  { %348 = vmatpush3.bf16.msra.mxu1 %v372_v7  ;;  %v320_v60 = vld [vmem:[%s514_s6] ss:$0 sm:$0xff] }
  0x11   :  { %349 = vmatprep.subr.bf16.mxu1 %v404_v1  ;;  %p390_p4 = pnand %p389_p3, %p383_p0 }
  0x14   :  { %350 = vmatpush3.bf16.msra.mxu1 %v373_v8 }
  0x15   :  { %351 = vmatprep.subr.bf16.mxu1 %v404_v1 }
  0x18   :  { %352 = vmatpush3.bf16.msra.mxu1 %v374_v9 }
  0x19   :  { %353 = vmatprep.subr.bf16.mxu1 %v404_v1 }
  0x1c   :  { %354 = vmatpush3.bf16.msra.mxu1 %v375_v10 }
  0x1d   :  { %355 = vmatprep.subr.bf16.mxu1 %v404_v1 }
  0x20   :  { %356 = vmatpush3.bf16.msra.mxu1 %v376_v11 }
  0xc9   :  { %v103_v13 = vpop.f32.mrf.mxu0 }
  0xca   :  { %v104_v15 = vadd.f32 %v305_v12, %v103_v13 }
  0xcb   :  { %v339_v14 = vpop.f32.mrf.mxu0 }
  0xcc   :  { %v110_v19 = vmax.f32 %v104_v15, 0.0 }
  0xcd   :  { %v106_v16 = vpop.f32.mrf.mxu0 }
  0xce   :  { %v107_v17 = vadd.f32 %v305_v12, %v106_v16 }
  0xcf   :  { %v340_v18 = vpop.f32.mrf.mxu0 }
  0xd0   :  { %v111_v20 = vmax.f32 %v107_v17, 0.0 }
  0xd2   :  { %v112_v21 = vpack.c.bf16 %v111_v20, %v110_v19 }
  0xd4   :  { %358 = vmatmul.mubr.bf16.vlgmr.msra.gmra.mxu1 %v112_v21 }
 0x194   :  { %v213_v23 = vpop.f32.mrf.mxu1 }
 0x195   :  { %v220_v24 = vadd.f32 %v213_v23, %v113_v22 }
 0x196   :  { %v359_v25 = vpop.f32.mrf.mxu1 }
 0x197   :  { %222 = vst.msk [vmem:[#allocation2] sm:$0xff] %vm32_vm1, %v220_v24 }
 0x198   :  { %v216_v27 = vpop.f32.mrf.mxu1 }
 0x199   :  { %v221_v28 = vadd.f32 %v216_v27, %v114_v26 }
 0x19a   :  { %v360_v29 = vpop.f32.mrf.mxu1 }
 0x19b   :  { %223 = vst.msk [vmem:[#allocation2 + $0x8] sm:$0xff] %vm32_vm1, %v221_v28 }
 0x19e   :  { %v229_v31 = vld [vmem:[#allocation2] sm:$0xff] }
 0x19f   :  { %v231_v33 = vadd.f32 %v229_v31, %v227_v30 }
 0x1a1   :  { %v240_v35 = vadd.f32 %v318_v32, %v231_v33 }
 0x1a2   :  { %v230_v36 = vld [vmem:[#allocation2 + $0x8] sm:$0xff] }
 0x1a3   :  { %v242_v37 = vsel %vm32_vm1, %v240_v35, 0.0  ;;  %v232_v38 = vadd.f32 %v230_v36, %v228_v34 }
 0x1a4   :  { %243 = vadd.xlane.f32.xlu0 %v242_v37 }
 0x1a5   :  { %v241_v39 = vadd.f32 %v318_v32, %v232_v38 }
 0x1a7   :  { %v245_v40 = vsel %vm32_vm1, %v241_v39, 0.0 }
 0x1a8   :  { %246 = vadd.xlane.f32.xlu0 %v245_v40 }
 0x22d   :  { %v244_v41 = vpop.xlane.xlu0 %243 }
 0x22e   :  { %v249_v42 = vmul.f32 0.03125, %v244_v41 }
 0x230   :  { %v251_v43 = vsub.f32 %v240_v35, %v249_v42 }
 0x231   :  { %v247_v44 = vpop.xlane.xlu0 %246 }
 0x232   :  { %v250_v45 = vmul.f32 0.03125, %v247_v44  ;;  %v253_v46 = vmul.f32 %v251_v43, %v251_v43 }
 0x234   :  { %v252_v47 = vsub.f32 %v241_v39, %v250_v45  ;;  %v255_v48 = vsel %vm32_vm1, %v253_v46, 0.0 }
 0x235   :  { %256 = vadd.xlane.f32.xlu1 %v255_v48 }
 0x236   :  { %v254_v49 = vmul.f32 %v252_v47, %v252_v47 }
 0x238   :  { %v258_v50 = vsel %vm32_vm1, %v254_v49, 0.0 }
 0x239   :  { %259 = vadd.xlane.f32.xlu1 %v258_v50 }
 0x2be   :  { %v257_v51 = vpop.xlane.xlu1 %256 }
 0x2bf   :  { %v261_v52 = vmul.f32 0.03125, %v257_v51 }
 0x2c1   :  { %v263_v53 = vadd.f32 1e-05, %v261_v52 }
 0x2c2   :  { %v260_v54 = vpop.xlane.xlu1 %259 }
 0x2c3   :  { %378 = vrsqrt.f32 %v263_v53  ;;  %v262_v55 = vmul.f32 0.03125, %v260_v54 }
 0x2c5   :  { %v264_v56 = vadd.f32 1e-05, %v262_v55 }
 0x2c7   :  { %380 = vrsqrt.f32 %v264_v56 }
 0x2d0   :  { %v379_v57 = vpop.eup %378 }
 0x2d1   :  { %v267_v59 = vmul.f32 %v379_v57, %v251_v43 }
 0x2d3   :  { %v276_v61 = vmul.f32 %v319_v58, %v267_v59 }
 0x2d4   :  { %v381_v62 = vpop.eup %380 }
 0x2d5   :  { %v268_v63 = vmul.f32 %v381_v62, %v252_v47  ;;  %v285_v0 = vadd.f32 %v320_v60, %v276_v61 }
 0x2d7   :  { %v277_v1 = vmul.f32 %v319_v58, %v268_v63  ;;  %287 = vst.msk [vmem:[#allocation3] sm:$0xff] %vm32_vm1, %v285_v0 }
 0x2d9   :  { %v286_v2 = vadd.f32 %v320_v60, %v277_v1 }
 0x2db   :  { %288 = vst.msk [vmem:[#allocation3 + $0x8] sm:$0xff] %vm32_vm1, %v286_v2 }
 0x2dc   :  { %393 = shalt.err (!%p390_p4)
}
 0x2dd   :  { %s407_s5 = smov 128   ;;  %s408_s6 = smov 8  }
 0x2de   :  { %300 = dma.vmem_to_hbm [thread:$0]  %s295_s27, 256, %s515_s7, [#allocation4], %s407_s5, %s407_s5, %s408_s6  }
 0x2df   :  { %402 = dma.done.wait [#allocation4], 256  }
 0x2e0   :  { %403 = vsyncadd [#allocation4], 4294967040 }
 0x2e1   :  { %304 = vsyncpa [#allocation4], 1 }

</bundles_post_ra>
